<compile_context>
chip_gen: v5e
topology: v5e:2x2
jax: 0.10.0
libtpu: 0.0.40
codegen_flags: <defaults>
</compile_context>

<pallas_src>
import functools

import jax
import jax.numpy as jnp
from jax.experimental import pallas as pl
from jax.experimental.pallas import tpu as pltpu

LANES = 128
TARGET_TILE_BYTES = 2 * 1024 * 1024   # ~2 MiB per (single) tile buffer
VMEM_LIMIT_BYTES = 32 * 1024 * 1024   # explicit scoped-VMEM limit (safe on all gens)


def _gmof_kernel(x_ref, o_ref, *, rho_sq, rho_4):
    x = x_ref[...].astype(jnp.float32)
    sq = x * x
    # out = rho^4 * r^2 / (r^2 + rho^2); exact reciprocal keeps 1e-6 tolerance.
    o_ref[...] = (rho_4 * sq * pl.reciprocal(sq + rho_sq, approx=False)).astype(
        o_ref.dtype
    )


def _round_up(a: int, b: int) -> int:
    return pl.cdiv(a, b) * b


def gmof(residual: jax.Array, rho: float = 1.0) -> jax.Array:
    """Pallas TPU implementation of GMoF.forward (elementwise, any shape)."""
    orig_shape = residual.shape
    dtype = residual.dtype
    n = residual.size
    if n == 0:
        return residual

    rho_sq = float(rho) ** 2
    rho_4 = rho_sq * rho_sq

    itemsize = jnp.dtype(dtype).itemsize
    # Rows per packed vreg sublane group: 8 (f32), 16 (bf16), 32 (int8/fp8).
    sublane_pack = 8 * max(1, 4 // itemsize)

    rows = pl.cdiv(n, LANES)
    target_rows = max(sublane_pack, TARGET_TILE_BYTES // (LANES * itemsize))
    # Single block for small inputs; ~2 MiB tiles for large ones.
    tile_rows = min(_round_up(rows, sublane_pack), _round_up(target_rows, sublane_pack))
    rows_padded = _round_up(rows, tile_rows)
    n_pad = rows_padded * LANES

    flat = residual.reshape(-1)
    if n_pad != n:
        # One pad op total; gmof(0) == 0 so zero padding is semantically safe.
        flat = jnp.pad(flat, (0, n_pad - n))
    x2d = flat.reshape(rows_padded, LANES)

    grid = (rows_padded // tile_rows,)

    out2d = pl.pallas_call(
        functools.partial(_gmof_kernel, rho_sq=rho_sq, rho_4=rho_4),
        out_shape=jax.ShapeDtypeStruct((rows_padded, LANES), dtype),
        grid_spec=pltpu.PrefetchScalarGridSpec(
            num_scalar_prefetch=0,
            grid=grid,
            in_specs=[pl.BlockSpec((tile_rows, LANES), lambda i: (i, 0))],
            out_specs=pl.BlockSpec((tile_rows, LANES), lambda i: (i, 0)),
        ),
        compiler_params=pltpu.CompilerParams(
            dimension_semantics=("parallel",),
            vmem_limit_bytes=VMEM_LIMIT_BYTES,
        ),
    )(x2d)

    if n_pad != n:
        return out2d.reshape(-1)[:n].reshape(orig_shape)
    return out2d.reshape(orig_shape)


def gmof_ref(residual: jax.Array, rho: float = 1.0) -> jax.Array:
    """Pure-JAX reference matching the PyTorch module."""
    rho_sq = float(rho) ** 2
    sq = residual**2
    dist = rho_sq * sq / (sq + rho_sq)
    return rho_sq * dist


if __name__ == "__main__":
    key = jax.random.PRNGKey(0)
    rho = 1.0  # module default (GMoF(rho=1))

    # Primary test: keypoint-error-like residual map, NCHW layout.
    x = jax.random.normal(key, (2, 4, 16, 16), dtype=jnp.float32)
    out = jax.block_until_ready(gmof(x, rho=rho))
    ref = gmof_ref(x, rho=rho)
    assert out.shape == x.shape and out.dtype == x.dtype
    assert jnp.allclose(out, ref, atol=1e-6, rtol=1e-6), float(
        jnp.max(jnp.abs(out - ref))
    )

    # Secondary test: ragged shape to exercise the single pad / slice path.
    key2 = jax.random.PRNGKey(0)
    y = jax.random.normal(key2, (5, 7, 3), dtype=jnp.float32)
    out_y = jax.block_until_ready(gmof(y, rho=rho))
    ref_y = gmof_ref(y, rho=rho)
    assert out_y.shape == y.shape and out_y.dtype == y.dtype
    assert jnp.allclose(out_y, ref_y, atol=1e-6, rtol=1e-6), float(
        jnp.max(jnp.abs(out_y - ref_y))
    )

    print("KERNEL_OK")
</pallas_src>

<mosaic_0001>
module attributes {stable_mosaic.version = 11 : i64} {
  func.func @_gmof_kernel(%arg0: i32, %arg1: memref<16x128xf32, #tpu.memory_space<vmem>>, %arg2: memref<16x128xf32, #tpu.memory_space<vmem>>) attributes {dimension_semantics = [#tpu.dimension_semantics<parallel>], iteration_bounds = array<i64: 1>, scalar_prefetch = 0 : i64, scratch_operands = 0 : i64, tpu.core_type = #tpu.core_type<tc>, window_params = [{transform_indices = @transform_0, window_bounds = array<i64: 16, 128>}, {transform_indices = @transform_1, window_bounds = array<i64: 16, 128>}]} {
    %c0 = arith.constant 0 : index
    %c0_0 = arith.constant 0 : index
    %0 = vector.load %arg1[%c0, %c0_0] : memref<16x128xf32, #tpu.memory_space<vmem>>, vector<16x128xf32>
    %1 = arith.mulf %0, %0 : vector<16x128xf32>
    %cst = arith.constant 1.000000e+00 : f32
    %2 = vector.broadcast %cst : f32 to vector<16x128xf32>
    %3 = arith.mulf %2, %1 : vector<16x128xf32>
    %cst_1 = arith.constant 1.000000e+00 : f32
    %4 = vector.broadcast %cst_1 : f32 to vector<16x128xf32>
    %5 = arith.addf %1, %4 : vector<16x128xf32>
    %6 = tpu.reciprocal %5 : vector<16x128xf32> -> vector<16x128xf32>
    %7 = arith.mulf %3, %6 : vector<16x128xf32>
    %c0_2 = arith.constant 0 : index
    %c0_3 = arith.constant 0 : index
    %8 = vector.load %arg2[%c0_2, %c0_3] : memref<16x128xf32, #tpu.memory_space<vmem>>, vector<16x128xf32>
    tpu.vector_store %arg2[%c0_2, %c0_3], %7 {strides = array<i32>} : memref<16x128xf32, #tpu.memory_space<vmem>>, vector<16x128xf32>,
    return
  }
  func.func @transform_0(%arg0: i32) -> (i32, i32) {
    %c0_i32 = arith.constant 0 : i32
    %c0_i32_0 = arith.constant 0 : i32
    return %arg0, %c0_i32 : i32, i32
  }
  func.func @transform_1(%arg0: i32) -> (i32, i32) {
    %c0_i32 = arith.constant 0 : i32
    %c0_i32_0 = arith.constant 0 : i32
    return %arg0, %c0_i32 : i32, i32
  }
}

</mosaic_0001>

<bundles_post_ra>
// kernel: tpu_custom_call.1
= control target key start
LH: loop header
LB: loop body
LE: loop exit
PB: predicated region body
PF: predicated region fallthrough
CT: control target
= control target key end

     0   :  { %6 = vsyncpa [#allocation3], 0  ;;  %s168_s0 = inlined_call_operand.hbm [shape: f32[16,128], index: 0, kind: input, shape index: {}]   ;;  %s169_s1 = inlined_call_operand.hbm [shape: f32[16,128], index: 1, kind: output, shape index: {}]  }
   0x1   :  { %7 = vsyncpa [#allocation4], 0  ;;  %s12_s8 = sshll.u32 %s168_s0, 4  ;;  %s142_s9 = smov [#allocation2]   ;;  %s13_s8 = int_to_ptr.hbm [resolvable:$true] %s12_s8 }
   0x2   :  { %s14_s10 = sshll.u32 %s142_s9, 4  ;;  %s143_s11 = smov 128   ;;  %s15_s10 = int_to_ptr.vmem [resolvable:$true] %s14_s10 }
   0x3   :  { %s144_s12 = smov 8  }
   0x4   :  { %20 = dma.hbm_to_vmem [thread:$0]  %s13_s8, 256, %s15_s10, [#allocation3], %s143_s11, %s143_s11, %s144_s12  }
   0x5   :  { %138 = dma.done.wait [#allocation3], 256  }
   0x6   :  { %139 = vsyncadd [#allocation3], 4294967040  ;;  %v25_v0 = vld [vmem:[#allocation2] sm:$0xff]  ;;  %v26_v1 = vld [vmem:[#allocation2 + $0x8] sm:$0xff]  ;;  %s145_s0 = smov [#allocation5]   ;;  %s69_s16 = sshll.u32 %s169_s1, 4  ;;  %s70_s16 = int_to_ptr.hbm [resolvable:$true] %s69_s16 }
   0x7   :  { %v27_v2 = vmul.f32 %v25_v0, %v25_v0  ;;  %v28_v3 = vmul.f32 %v26_v1, %v26_v1  ;;  %s67_s13 = sshll.u32 %s145_s0, 4  ;;  %s68_s13 = int_to_ptr.vmem [resolvable:$true] %s67_s13 }
   0x9   :  { %v29_v4 = vadd.f32 1.0, %v27_v2  ;;  %v30_v5 = vadd.f32 1.0, %v28_v3 }
   0xb   :  { %86 = vrcp.f32 %v29_v4  ;;  %vm36_vm0 = vweird.f32 %v29_v4  ;;  %v42_v9 = vand.u32 2147483648, %v29_v4  ;;  %v40_v12 = vand.u32 2147483647, %v29_v4 }
   0xc   :  { %88 = vrcp.f32 %v30_v5  ;;  %v56_v13 = vand.u32 2147483648, %v30_v5  ;;  %vm50_vm2 = vweird.f32 %v30_v5  ;;  %v54_v15 = vand.u32 2147483647, %v30_v5 }
   0xd   :  { %v43_v17 = vor.u32 1.1754944e-38, %v42_v9  ;;  %vm41_vm5 = vcmp.eq.f32.partialorder %v40_v12, 8.507059e+37 }
   0xe   :  { %v57_v20 = vor.u32 1.1754944e-38, %v56_v13  ;;  %vm55_vm7 = vcmp.eq.f32.partialorder %v54_v15, 8.507059e+37 }
  0x11   :  { %v87_v6 = vpop.eup %86 }
  0x12   :  { %v89_v7 = vpop.eup %88  ;;  %v32_v8 = vmul.f32 %v87_v6, %v29_v4  ;;  %vm37_vm1 = vweird.f32 %v87_v6 }
  0x13   :  { %v46_v10 = vmul.f32 %v89_v7, %v30_v5  ;;  %vm51_vm3 = vweird.f32 %v89_v7  ;;  %vm38_vm4 = vmor %vm36_vm0, %vm37_vm1 }
  0x14   :  { %v33_v11 = vsub.f32 1.0, %v32_v8  ;;  %vm52_vm6 = vmor %vm50_vm2, %vm51_vm3 }
  0x15   :  { %v47_v14 = vsub.f32 1.0, %v46_v10 }
  0x16   :  { %v34_v16 = vmul.f32 %v87_v6, %v33_v11 }
  0x17   :  { %v48_v18 = vmul.f32 %v89_v7, %v47_v14 }
  0x18   :  { %v35_v19 = vadd.f32 %v87_v6, %v34_v16 }
  0x19   :  { %v49_v21 = vadd.f32 %v89_v7, %v48_v18 }
  0x1a   :  { %v39_v22 = vsel %vm38_vm4, %v87_v6, %v35_v19 }
  0x1b   :  { %v44_v23 = vsel %vm41_vm5, %v43_v17, %v39_v22  ;;  %v53_v24 = vsel %vm52_vm6, %v89_v7, %v49_v21 }
  0x1c   :  { %v59_v25 = vmul.f32 %v44_v23, %v27_v2  ;;  %v58_v26 = vsel %vm55_vm7, %v57_v20, %v53_v24 }
  0x1d   :  { %v60_v27 = vmul.f32 %v58_v26, %v28_v3 }
  0x1e   :  { %61 = vst [vmem:[#allocation5] sm:$0xff] %v59_v25 }
  0x1f   :  { %62 = vst [vmem:[#allocation5 + $0x8] sm:$0xff] %v60_v27 }
  0x20   :  { %75 = dma.vmem_to_hbm [thread:$0]  %s68_s13, 256, %s70_s16, [#allocation4], %s143_s11, %s143_s11, %s144_s12  }
  0x21   :  { %140 = dma.done.wait [#allocation4], 256  }
  0x22   :  { %141 = vsyncadd [#allocation4], 4294967040 }
  0x23   :  { %80 = vsyncpa [#allocation3], 1 }
  0x24   :  { %81 = vsyncpa [#allocation4], 1 }

</bundles_post_ra>
